<compile_context>
chip_gen: v5e
topology: v5e:2x2
jax: 0.10.0
libtpu: 0.0.40
codegen_flags: <defaults>
</compile_context>

<pallas_src>
import jax
import jax.numpy as jnp
from jax.experimental import pallas as pl
from jax.experimental.pallas import tpu as pltpu


# ---------------------------------------------------------------------------
# Recurrent cell kernels (one grid step == one (direction, time) point)
# ---------------------------------------------------------------------------

def _lstm_cell_kernel(x_ref, wih_ref, whh_ref, b_ref, out_ref, h_scr, c_scr):
    t = pl.program_id(1)

    @pl.when(t == 0)
    def _():
        h_scr[...] = jnp.zeros_like(h_scr)
        c_scr[...] = jnp.zeros_like(c_scr)

    H = h_scr.shape[-1]
    x_t = x_ref[0]                                     # (B, I)
    h = h_scr[...]                                     # (B, H) f32
    c = c_scr[...]

    # gates = x_t @ W_ih^T + h @ W_hh^T + (b_ih + b_hh)   -> (B, 4H), lane-dense
    g = (jnp.dot(x_t, wih_ref[0], preferred_element_type=jnp.float32)
         + jnp.dot(h, whh_ref[0], preferred_element_type=jnp.float32)
         + b_ref[0])

    i = jax.nn.sigmoid(g[:, 0 * H:1 * H])
    f = jax.nn.sigmoid(g[:, 1 * H:2 * H])
    gg = jnp.tanh(g[:, 2 * H:3 * H])
    o = jax.nn.sigmoid(g[:, 3 * H:4 * H])

    c_new = f * c + i * gg
    h_new = o * jnp.tanh(c_new)

    c_scr[...] = c_new
    h_scr[...] = h_new
    out_ref[0, 0] = h_new.astype(out_ref.dtype)


def _gru_cell_kernel(x_ref, wih_ref, whh_ref, bih_ref, bhh_ref, out_ref, h_scr):
    t = pl.program_id(1)

    @pl.when(t == 0)
    def _():
        h_scr[...] = jnp.zeros_like(h_scr)

    O = h_scr.shape[-1]
    x_t = x_ref[0]                                     # (B, F)
    h = h_scr[...]                                     # (B, O) f32

    gx = jnp.dot(x_t, wih_ref[0], preferred_element_type=jnp.float32) + bih_ref[0]
    gh = jnp.dot(h, whh_ref[0], preferred_element_type=jnp.float32) + bhh_ref[0]

    r = jax.nn.sigmoid(gx[:, 0 * O:1 * O] + gh[:, 0 * O:1 * O])
    z = jax.nn.sigmoid(gx[:, 1 * O:2 * O] + gh[:, 1 * O:2 * O])
    n = jnp.tanh(gx[:, 2 * O:3 * O] + r * gh[:, 2 * O:3 * O])
    h_new = (1.0 - z) * n + z * h

    h_scr[...] = h_new
    out_ref[0, 0] = h_new.astype(out_ref.dtype)


# ---------------------------------------------------------------------------
# Bidirectional driver: grid = (direction, time); backward direction walks the
# sequence via the index_map (no wrapper-side flips / extra HBM traffic).
# ---------------------------------------------------------------------------

def _bidir_rnn(cell_kernel, xt, wih, whh, biases, n_state):
    """xt: (S, B, F) time-major. wih: (2, F, G). whh: (2, H, G).
    biases: tuple of (2, 1, G) arrays. Returns (2, S, B, H)."""
    S, B, F = xt.shape
    H = whh.shape[1]
    G = wih.shape[2]

    def t_of(d, t):
        # forward: t ; backward: S - 1 - t   (pure scalar arithmetic)
        return t * (1 - d) + (S - 1 - t) * d

    bias_specs = [pl.BlockSpec((1, 1, G), lambda d, t: (d, 0, 0)) for _ in biases]

    return pl.pallas_call(
        cell_kernel,
        out_shape=jax.ShapeDtypeStruct((2, S, B, H), xt.dtype),
        grid_spec=pltpu.PrefetchScalarGridSpec(
            num_scalar_prefetch=0,
            grid=(2, S),
            in_specs=[
                pl.BlockSpec((1, B, F), lambda d, t: (t_of(d, t), 0, 0)),   # x_t
                pl.BlockSpec((1, F, G), lambda d, t: (d, 0, 0)),            # W_ih^T
                pl.BlockSpec((1, H, G), lambda d, t: (d, 0, 0)),            # W_hh^T
                *bias_specs,
            ],
            out_specs=pl.BlockSpec((1, 1, B, H),
                                   lambda d, t: (d, t_of(d, t), 0, 0)),
            scratch_shapes=[pltpu.VMEM((B, H), jnp.float32)] * n_state,
        ),
        compiler_params=pltpu.CompilerParams(
            # time axis is a true recurrence -> "arbitrary"; direction reuses
            # the state scratch (reset at t == 0) so keep it sequential too.
            dimension_semantics=("arbitrary", "arbitrary")),
    )(xt, wih, whh, *biases)


# ---------------------------------------------------------------------------
# Pooling kernel: MaxPool1d(2)/AvgPool1d(2) over features at the last step.
# Inputs are the even / odd feature lanes of the last GRU step (deinterleaved
# in the wrapper -> kernel is purely element-wise, no minor-dim reshape).
# ---------------------------------------------------------------------------

def _pool_kernel(ev_ref, od_ref, out_ref):
    e = ev_ref[...].astype(jnp.float32)
    o = od_ref[...].astype(jnp.float32)
    P = e.shape[-1]
    out_ref[:, :P] = jnp.maximum(e, o).astype(out_ref.dtype)       # max pool
    out_ref[:, P:] = (0.5 * (e + o)).astype(out_ref.dtype)         # avg pool


def _pool(even, odd):
    B, P = even.shape
    return pl.pallas_call(
        _pool_kernel,
        out_shape=jax.ShapeDtypeStruct((B, 2 * P), even.dtype),
        grid_spec=pltpu.PrefetchScalarGridSpec(
            num_scalar_prefetch=0,
            grid=(1,),
            in_specs=[pl.BlockSpec((B, P), lambda i: (0, 0)),
                      pl.BlockSpec((B, P), lambda i: (0, 0))],
            out_specs=pl.BlockSpec((B, 2 * P), lambda i: (0, 0)),
        ),
        compiler_params=pltpu.CompilerParams(dimension_semantics=("arbitrary",)),
    )(even, odd)


# ---------------------------------------------------------------------------
# Full forward
# ---------------------------------------------------------------------------

def lstm_gru_pool(x, wih_l, whh_l, b_l, wih_g, whh_g, bih_g, bhh_g):
    """x: (B, S, I).  Weights are per-direction stacked, already transposed:
    wih_l (2, I, 4H), whh_l (2, H, 4H), b_l (2, 1, 4H)  [b_ih + b_hh],
    wih_g (2, 2H, 3O), whh_g (2, O, 3O), bih_g/bhh_g (2, 1, 3O)."""
    B, S, _ = x.shape

    xt = jnp.transpose(x, (1, 0, 2))                     # time-major (S, B, I)

    # --- bidirectional LSTM ---
    y_l = _bidir_rnn(_lstm_cell_kernel, xt, wih_l, whh_l, (b_l,), n_state=2)
    lstm_cat = jnp.concatenate([y_l[0], y_l[1]], axis=-1)   # (S, B, 2H), [fwd|bwd]

    # --- bidirectional GRU ---
    y_g = _bidir_rnn(_gru_cell_kernel, lstm_cat, wih_g, whh_g,
                     (bih_g, bhh_g), n_state=1)

    # --- last time step, pooled over feature pairs ---
    last = jnp.concatenate([y_g[0, S - 1], y_g[1, S - 1]], axis=-1)  # (B, 2O)
    even = last[:, 0::2]          # layout plumbing (tiny tensors)
    odd = last[:, 1::2]
    return _pool(even, odd)       # (B, 2O) = cat([max_pool, avg_pool], 1)


# ---------------------------------------------------------------------------
# Pure-JAX reference (PyTorch cell equations, same weight layout)
# ---------------------------------------------------------------------------

def _ref_bidir_lstm(xt, wih, whh, b):
    S, B, _ = xt.shape
    H = whh.shape[1]

    def run(d):
        h = jnp.zeros((B, H), jnp.float32)
        c = jnp.zeros((B, H), jnp.float32)
        outs = [None] * S
        order = range(S) if d == 0 else range(S - 1, -1, -1)
        for t in order:
            g = xt[t] @ wih[d] + h @ whh[d] + b[d, 0]
            i = jax.nn.sigmoid(g[:, 0 * H:1 * H])
            f = jax.nn.sigmoid(g[:, 1 * H:2 * H])
            gg = jnp.tanh(g[:, 2 * H:3 * H])
            o = jax.nn.sigmoid(g[:, 3 * H:4 * H])
            c = f * c + i * gg
            h = o * jnp.tanh(c)
            outs[t] = h
        return jnp.stack(outs, axis=0)

    return jnp.concatenate([run(0), run(1)], axis=-1)


def _ref_bidir_gru(xt, wih, whh, bih, bhh):
    S, B, _ = xt.shape
    O = whh.shape[1]

    def run(d):
        h = jnp.zeros((B, O), jnp.float32)
        outs = [None] * S
        order = range(S) if d == 0 else range(S - 1, -1, -1)
        for t in order:
            gx = xt[t] @ wih[d] + bih[d, 0]
            gh = h @ whh[d] + bhh[d, 0]
            r = jax.nn.sigmoid(gx[:, 0 * O:1 * O] + gh[:, 0 * O:1 * O])
            z = jax.nn.sigmoid(gx[:, 1 * O:2 * O] + gh[:, 1 * O:2 * O])
            n = jnp.tanh(gx[:, 2 * O:3 * O] + r * gh[:, 2 * O:3 * O])
            h = (1.0 - z) * n + z * h
            outs[t] = h
        return jnp.stack(outs, axis=0)

    return jnp.concatenate([run(0), run(1)], axis=-1)


def _reference(x, wih_l, whh_l, b_l, wih_g, whh_g, bih_g, bhh_g):
    B, S, _ = x.shape
    xt = jnp.transpose(x, (1, 0, 2))
    lstm = _ref_bidir_lstm(xt, wih_l, whh_l, b_l)
    gru = _ref_bidir_gru(lstm, wih_g, whh_g, bih_g, bhh_g)
    last = gru[S - 1]                                    # (B, 2O)
    pairs = last.reshape(B, -1, 2)
    return jnp.concatenate([pairs.max(axis=-1), pairs.mean(axis=-1)], axis=-1)


# ---------------------------------------------------------------------------

def _uniform(key, shape, bound):
    return jax.random.uniform(key, shape, jnp.float32, minval=-bound, maxval=bound)


if __name__ == "__main__":
    key = jax.random.PRNGKey(0)
    keys = jax.random.split(key, 9)

    # batch=8 (sublane aligned), seq=8, input=32, hidden=32 (4H=128 lane-dense),
    # output=16
    B, S, I, H, O = 8, 8, 32, 32, 16

    x = jax.random.normal(keys[0], (B, S, I), dtype=jnp.float32)

    bl = 1.0 / (H ** 0.5)     # PyTorch default RNN init bound
    bg = 1.0 / (O ** 0.5)
    wih_l = _uniform(keys[1], (2, I, 4 * H), bl)
    whh_l = _uniform(keys[2], (2, H, 4 * H), bl)
    b_l = _uniform(keys[3], (2, 1, 4 * H), bl) + _uniform(keys[4], (2, 1, 4 * H), bl)
    wih_g = _uniform(keys[5], (2, 2 * H, 3 * O), bg)
    whh_g = _uniform(keys[6], (2, O, 3 * O), bg)
    bih_g = _uniform(keys[7], (2, 1, 3 * O), bg)
    bhh_g = _uniform(keys[8], (2, 1, 3 * O), bg)

    out = lstm_gru_pool(x, wih_l, whh_l, b_l, wih_g, whh_g, bih_g, bhh_g)
    out = jax.block_until_ready(out)

    ref = _reference(x, wih_l, whh_l, b_l, wih_g, whh_g, bih_g, bhh_g)
    assert out.shape == (B, 2 * O), out.shape
    max_err = float(jnp.max(jnp.abs(out - ref)))
    assert jnp.allclose(out, ref, atol=1e-4, rtol=1e-4), f"max abs err {max_err}"

    print("KERNEL_OK")
</pallas_src>

<mosaic_0001>
module attributes {stable_mosaic.version = 11 : i64} {
  func.func @_lstm_cell_kernel(%arg0: i32, %arg1: i32, %arg2: memref<1x8x32xf32, #tpu.memory_space<vmem>>, %arg3: memref<1x32x128xf32, #tpu.memory_space<vmem>>, %arg4: memref<1x32x128xf32, #tpu.memory_space<vmem>>, %arg5: memref<1x1x128xf32, #tpu.memory_space<vmem>>, %arg6: memref<1x1x8x32xf32, #tpu.memory_space<vmem>>, %arg7: memref<8x32xf32, #tpu.memory_space<vmem>>, %arg8: memref<8x32xf32, #tpu.memory_space<vmem>>) attributes {dimension_semantics = [#tpu.dimension_semantics<arbitrary>, #tpu.dimension_semantics<arbitrary>], iteration_bounds = array<i64: 2, 8>, scalar_prefetch = 0 : i64, scratch_operands = 2 : i64, tpu.core_type = #tpu.core_type<tc>, window_params = [{transform_indices = @transform_0, window_bounds = array<i64: 1, 8, 32>}, {transform_indices = @transform_1, window_bounds = array<i64: 1, 32, 128>}, {transform_indices = @transform_2, window_bounds = array<i64: 1, 32, 128>}, {transform_indices = @transform_3, window_bounds = array<i64: 1, 1, 128>}, {transform_indices = @transform_4, window_bounds = array<i64: 1, 1, 8, 32>}]} {
    %c0_i32 = arith.constant 0 : i32
    %0 = arith.cmpi eq, %arg1, %c0_i32 : i32
    %1 = arith.extui %0 : i1 to i32
    %c0_i32_0 = arith.constant 0 : i32
    %2 = arith.cmpi ne, %1, %c0_i32_0 : i32
    scf.if %2 {
      %cst_28 = arith.constant 0.000000e+00 : f32
      %48 = vector.broadcast %cst_28 : f32 to vector<8x32xf32>
      %c0_29 = arith.constant 0 : index
      %c0_30 = arith.constant 0 : index
      %49 = vector.load %arg7[%c0_29, %c0_30] : memref<8x32xf32, #tpu.memory_space<vmem>>, vector<8x32xf32>
      tpu.vector_store %arg7[%c0_29, %c0_30], %48 {strides = array<i32>} : memref<8x32xf32, #tpu.memory_space<vmem>>, vector<8x32xf32>,
      %cst_31 = arith.constant 0.000000e+00 : f32
      %50 = vector.broadcast %cst_31 : f32 to vector<8x32xf32>
      %c0_32 = arith.constant 0 : index
      %c0_33 = arith.constant 0 : index
      %51 = vector.load %arg8[%c0_32, %c0_33] : memref<8x32xf32, #tpu.memory_space<vmem>>, vector<8x32xf32>
      tpu.vector_store %arg8[%c0_32, %c0_33], %50 {strides = array<i32>} : memref<8x32xf32, #tpu.memory_space<vmem>>, vector<8x32xf32>,
    } else {
    }
    %c0 = arith.constant 0 : index
    %c0_1 = arith.constant 0 : index
    %c0_2 = arith.constant 0 : index
    %3 = vector.load %arg2[%c0, %c0_1, %c0_2] : memref<1x8x32xf32, #tpu.memory_space<vmem>>, vector<1x8x32xf32>
    %4 = vector.shape_cast %3 : vector<1x8x32xf32> to vector<8x32xf32>
    %c0_3 = arith.constant 0 : index
    %c0_4 = arith.constant 0 : index
    %5 = vector.load %arg7[%c0_3, %c0_4] : memref<8x32xf32, #tpu.memory_space<vmem>>, vector<8x32xf32>
    %c0_5 = arith.constant 0 : index
    %c0_6 = arith.constant 0 : index
    %6 = vector.load %arg8[%c0_5, %c0_6] : memref<8x32xf32, #tpu.memory_space<vmem>>, vector<8x32xf32>
    %c0_7 = arith.constant 0 : index
    %c0_8 = arith.constant 0 : index
    %c0_9 = arith.constant 0 : index
    %7 = vector.load %arg3[%c0_7, %c0_8, %c0_9] : memref<1x32x128xf32, #tpu.memory_space<vmem>>, vector<1x32x128xf32>
    %8 = vector.shape_cast %7 : vector<1x32x128xf32> to vector<32x128xf32>
    %cst = arith.constant dense<0.000000e+00> : vector<8x128xf32>
    %9 = tpu.matmul %4, %8, %cst {dimension_numbers = #tpu.dot_dimension_numbers<[1], [0], [0], [1], [0, 0, 1, 1], [], []>} : vector<8x32xf32>, vector<32x128xf32>, vector<8x128xf32> -> vector<8x128xf32>
    %c0_10 = arith.constant 0 : index
    %c0_11 = arith.constant 0 : index
    %c0_12 = arith.constant 0 : index
    %10 = vector.load %arg4[%c0_10, %c0_11, %c0_12] : memref<1x32x128xf32, #tpu.memory_space<vmem>>, vector<1x32x128xf32>
    %11 = vector.shape_cast %10 : vector<1x32x128xf32> to vector<32x128xf32>
    %cst_13 = arith.constant dense<0.000000e+00> : vector<8x128xf32>
    %12 = tpu.matmul %5, %11, %cst_13 {dimension_numbers = #tpu.dot_dimension_numbers<[1], [0], [0], [1], [0, 0, 1, 1], [], []>} : vector<8x32xf32>, vector<32x128xf32>, vector<8x128xf32> -> vector<8x128xf32>
    %13 = arith.addf %9, %12 : vector<8x128xf32>
    %c0_14 = arith.constant 0 : index
    %c0_15 = arith.constant 0 : index
    %c0_16 = arith.constant 0 : index
    %14 = vector.load %arg5[%c0_14, %c0_15, %c0_16] : memref<1x1x128xf32, #tpu.memory_space<vmem>>, vector<1x1x128xf32>
    %15 = vector.shape_cast %14 : vector<1x1x128xf32> to vector<1x128xf32>
    %16 = vector.broadcast %15 : vector<1x128xf32> to vector<8x128xf32>
    %17 = arith.addf %13, %16 : vector<8x128xf32>
    %18 = vector.extract_strided_slice %17 {offsets = [0, 0], sizes = [8, 32], strides = [1, 1]} : vector<8x128xf32> to vector<8x32xf32>
    %19 = arith.negf %18 : vector<8x32xf32>
    %20 = math.exp %19 : vector<8x32xf32>
    %cst_17 = arith.constant 1.000000e+00 : f32
    %21 = vector.broadcast %cst_17 : f32 to vector<8x32xf32>
    %22 = arith.addf %21, %20 : vector<8x32xf32>
    %23 = arith.divf %21, %22 : vector<8x32xf32>
    %24 = vector.extract_strided_slice %17 {offsets = [0, 32], sizes = [8, 32], strides = [1, 1]} : vector<8x128xf32> to vector<8x32xf32>
    %25 = arith.negf %24 : vector<8x32xf32>
    %26 = math.exp %25 : vector<8x32xf32>
    %cst_18 = arith.constant 1.000000e+00 : f32
    %27 = vector.broadcast %cst_18 : f32 to vector<8x32xf32>
    %28 = arith.addf %27, %26 : vector<8x32xf32>
    %29 = arith.divf %27, %28 : vector<8x32xf32>
    %30 = vector.extract_strided_slice %17 {offsets = [0, 64], sizes = [8, 32], strides = [1, 1]} : vector<8x128xf32> to vector<8x32xf32>
    %31 = math.tanh %30 : vector<8x32xf32>
    %32 = vector.extract_strided_slice %17 {offsets = [0, 96], sizes = [8, 32], strides = [1, 1]} : vector<8x128xf32> to vector<8x32xf32>
    %33 = arith.negf %32 : vector<8x32xf32>
    %34 = math.exp %33 : vector<8x32xf32>
    %cst_19 = arith.constant 1.000000e+00 : f32
    %35 = vector.broadcast %cst_19 : f32 to vector<8x32xf32>
    %36 = arith.addf %35, %34 : vector<8x32xf32>
    %37 = arith.divf %35, %36 : vector<8x32xf32>
    %38 = arith.mulf %29, %6 : vector<8x32xf32>
    %39 = arith.mulf %23, %31 : vector<8x32xf32>
    %40 = arith.addf %38, %39 : vector<8x32xf32>
    %41 = math.tanh %40 : vector<8x32xf32>
    %42 = arith.mulf %37, %41 : vector<8x32xf32>
    %c0_20 = arith.constant 0 : index
    %c0_21 = arith.constant 0 : index
    %43 = vector.load %arg8[%c0_20, %c0_21] : memref<8x32xf32, #tpu.memory_space<vmem>>, vector<8x32xf32>
    tpu.vector_store %arg8[%c0_20, %c0_21], %40 {strides = array<i32>} : memref<8x32xf32, #tpu.memory_space<vmem>>, vector<8x32xf32>,
    %c0_22 = arith.constant 0 : index
    %c0_23 = arith.constant 0 : index
    %44 = vector.load %arg7[%c0_22, %c0_23] : memref<8x32xf32, #tpu.memory_space<vmem>>, vector<8x32xf32>
    tpu.vector_store %arg7[%c0_22, %c0_23], %42 {strides = array<i32>} : memref<8x32xf32, #tpu.memory_space<vmem>>, vector<8x32xf32>,
    %c0_24 = arith.constant 0 : index
    %c0_25 = arith.constant 0 : index
    %c0_26 = arith.constant 0 : index
    %c0_27 = arith.constant 0 : index
    %45 = vector.load %arg6[%c0_24, %c0_25, %c0_26, %c0_27] : memref<1x1x8x32xf32, #tpu.memory_space<vmem>>, vector<1x1x8x32xf32>
    %46 = vector.shape_cast %45 : vector<1x1x8x32xf32> to vector<8x32xf32>
    %47 = vector.shape_cast %42 : vector<8x32xf32> to vector<1x1x8x32xf32>
    tpu.vector_store %arg6[%c0_24, %c0_25, %c0_26, %c0_27], %47 {strides = array<i32>} : memref<1x1x8x32xf32, #tpu.memory_space<vmem>>, vector<1x1x8x32xf32>,
    return
  }
  func.func @transform_0(%arg0: i32, %arg1: i32) -> (i32, i32, i32) {
    %c1_i32 = arith.constant 1 : i32
    %0 = arith.subi %c1_i32, %arg0 : i32
    %1 = arith.muli %arg1, %0 : i32
    %c7_i32 = arith.constant 7 : i32
    %2 = arith.subi %c7_i32, %arg1 : i32
    %3 = arith.muli %2, %arg0 : i32
    %4 = arith.addi %1, %3 : i32
    %c0_i32 = arith.constant 0 : i32
    %c0_i32_0 = arith.constant 0 : i32
    %c0_i32_1 = arith.constant 0 : i32
    return %4, %c0_i32, %c0_i32_0 : i32, i32, i32
  }
  func.func @transform_1(%arg0: i32, %arg1: i32) -> (i32, i32, i32) {
    %c0_i32 = arith.constant 0 : i32
    %c0_i32_0 = arith.constant 0 : i32
    %c0_i32_1 = arith.constant 0 : i32
    return %arg0, %c0_i32, %c0_i32_0 : i32, i32, i32
  }
  func.func @transform_2(%arg0: i32, %arg1: i32) -> (i32, i32, i32) {
    %c0_i32 = arith.constant 0 : i32
    %c0_i32_0 = arith.constant 0 : i32
    %c0_i32_1 = arith.constant 0 : i32
    return %arg0, %c0_i32, %c0_i32_0 : i32, i32, i32
  }
  func.func @transform_3(%arg0: i32, %arg1: i32) -> (i32, i32, i32) {
    %c0_i32 = arith.constant 0 : i32
    %c0_i32_0 = arith.constant 0 : i32
    %c0_i32_1 = arith.constant 0 : i32
    return %arg0, %c0_i32, %c0_i32_0 : i32, i32, i32
  }
  func.func @transform_4(%arg0: i32, %arg1: i32) -> (i32, i32, i32, i32) {
    %c1_i32 = arith.constant 1 : i32
    %0 = arith.subi %c1_i32, %arg0 : i32
    %1 = arith.muli %arg1, %0 : i32
    %c7_i32 = arith.constant 7 : i32
    %2 = arith.subi %c7_i32, %arg1 : i32
    %3 = arith.muli %2, %arg0 : i32
    %4 = arith.addi %1, %3 : i32
    %c0_i32 = arith.constant 0 : i32
    %c0_i32_0 = arith.constant 0 : i32
    %c0_i32_1 = arith.constant 0 : i32
    return %arg0, %4, %c0_i32, %c0_i32_0 : i32, i32, i32, i32
  }
}

</mosaic_0001>

<bundles_post_ra>
// kernel: tpu_custom_call.1
= control target key start
LH: loop header
LB: loop body
LE: loop exit
PB: predicated region body
PF: predicated region fallthrough
CT: control target
= control target key end

     0   :  { %s1431_s0 = inlined_call_operand.hbm [shape: f32[8,8,32], index: 0, kind: input, shape index: {}]   ;;  %s1432_s1 = inlined_call_operand.hbm [shape: f32[2,32,128], index: 1, kind: input, shape index: {}]   ;;  %s1433_s2 = inlined_call_operand.hbm [shape: f32[2,32,128], index: 2, kind: input, shape index: {}]   ;;  %s1434_s3 = inlined_call_operand.vmem [shape: f32[2,1,128], index: 3, kind: input, shape index: {}]   ;;  %s1435_s4 = inlined_call_operand.hbm [shape: f32[2,8,8,32], index: 4, kind: output, shape index: {}]  }
   0x1   :  { %1448 = sst [smem:[#allocation26_spill]] %s1432_s1 }
   0x2   :  { %1449 = sst [smem:[#allocation27_spill]] %s1433_s2 }
   0x3   :  { %1450 = sst [smem:[#allocation28_spill]] %s1434_s3 }
   0x4   :  { %1451 = sst [smem:[#allocation29_spill]] %s1435_s4 }
   0x5   :  { %9 = vsyncpa [#allocation5], 0 }
   0x6   :  { %11 = vsyncpa [#allocation5 + $0x1], 0 }
   0x7   :  { %12 = vsyncpa [#allocation8], 0 }
   0x8   :  { %14 = vsyncpa [#allocation8 + $0x1], 0 }
   0x9   :  { %15 = vsyncpa [#allocation6], 0 }
   0xa   :  { %17 = vsyncpa [#allocation6 + $0x1], 0  ;;  %s1093_s15 = smov 0   ;;  %s1095_s16 = smov 0  }
   0xb   :  { %s1097_s17 = smov 0   ;;  %s1099_s18 = smov 0  }
   0xc   :  { %s1101_s19 = smov 0   ;;  %s1103_s20 = smov 0  }
   0xd   :  { %s1105_s21 = smov 0   ;;  %s1107_s22 = smov 0  }
   0xe   :  { %s1109_s23 = smov 0   ;;  %s1111_s24 = smov 0  }
   0xf   :  { %s1113_s25 = smov 0   ;;  %s1115_s26 = smov 0  }
  0x10   :  { %s1117_s27 = smov 0   ;;  %s1119_s28 = smov 0  }
  0x11 LB: > { %1452 = sst [smem:[#allocation14_spill]] %s1016_s17  ;;  %p60_p0 = scmp.eq.s32.totalorder %s1060_s28, 0  ;;  %s1060_s28 = sphi %s1119_s28, %s23_s28   ;;  %s1056_s27 = sphi %s1117_s27, %s1494_s27   ;;  %s1052_s26 = sphi %s1115_s26, %s1493_s26   ;;  %s1048_s25 = sphi %s1113_s25, %s1492_s25   ;;  %s1044_s24 = sphi %s1111_s24, %s1501_s24   ;;  %s1040_s23 = sphi %s1109_s23, %s1490_s23   ;;  %s1036_s22 = sphi %s1107_s22, %s1500_s22   ;;  %s1032_s21 = sphi %s1105_s21, %s1499_s21   ;;  %s1028_s20 = sphi %s1103_s20, %s1488_s20   ;;  %s1024_s19 = sphi %s1101_s19, %s1498_s19   ;;  %s1020_s18 = sphi %s1099_s18, %s1497_s18   ;;  %s1016_s17 = sphi %s1097_s17, %s1486_s17   ;;  %s1012_s16 = sphi %s1095_s16, %s1496_s16   ;;  %s1008_s15 = sphi %s1093_s15, %s1495_s15  }
  0x12   : > { %1453 = sst [smem:[#allocation15_spill]] %s1028_s20  ;;  %p85_p1 = scmp.ne.s32.totalorder %s1028_s20, %s1024_s19 }
  0x13   : > { %1454 = sst [smem:[#allocation16_spill]] %s1040_s23  ;;  %p91_p2 = scmp.ne.s32.totalorder %s1024_s19, %s1020_s18 }
  0x14   : > { %1455 = sst [smem:[#allocation17_spill]] %s1044_s24  ;;  %p87_p3 = por %p85_p1, %p60_p0 }
  0x15   : > { %1456 = sst [smem:[#allocation18_spill]] %s1052_s26  ;;  %p691_p4 = scmp.lt.s32.totalorder %s1060_s28, 16 }
  0x16   : > { %1457 = sst [smem:[#allocation19_spill]] %s1056_s27  ;;  %s229_s29 = sand.u32 1, %s1060_s28  }
  0x17   : > { %s231_s30 = sand.u32 1, %s1028_s20   ;;  %s667_s6 = sshll.u32 %s1056_s27, 5 }
  0x18   : > { %s647_s5 = sshll.u32 %s231_s30, 5  ;;  %s1458_s1 = sld [smem:[#allocation26_spill]] }
  0x19   : > { %s233_s10 = scalar_lea.vmem [#allocation7], %s647_s5  ;;  %p1179_p5 = pnand %p691_p4, %p87_p3 }
  0x1a   : > { %s241_s11 = sshll.u32 %s233_s10, 4  ;;  %s1183_s14 = scalar_lea.sflag [#allocation8], %s229_s29  ;;  %s242_s11 = int_to_ptr.vmem [resolvable:$true] %s241_s11 }
  0x1b   : > { %s1437_s30 = smov 128   ;;  %s1438_s7 = smov 8  }
  0x1c   : > { %s1460_s2 = sld [smem:[#allocation27_spill]]  ;;  %p653_p6 = scmp.ge.s32.totalorder %s1060_s28, 1 }
  0x1d   : > { %p277_p7 = scmp.lt.s32.totalorder %s1060_s28, 17  ;;  %s39_s8 = ssub.s32 1, %s1056_s27 }
  0x1e   : > { %s238_s9 = scalar_lea.hbm %s1458_s1, %s667_s6  ;;  %s255_s1 = scalar_lea.vmem [#allocation9], %s647_s5 }
  0x1f   : > { %s239_s12 = sshll.u32 %s238_s9, 4  ;;  %s1194_s4 = sshll.u32 %s255_s1, 4  ;;  %s240_s12 = int_to_ptr.hbm [resolvable:$true] %s239_s12 }
  0x20   : > { %683 = dma.hbm_to_vmem [thread:$0]  (!%p1179_p5), %s240_s12, 512, %s242_s11, %s1183_s14, %s1437_s30, %s1437_s30, %s1438_s7  }
  0x21   : > { %1461 = sst [smem:[#allocation20_spill]] %s1194_s4  ;;  %p1201_p8 = pnand %p653_p6, %p277_p7 }
  0x22   : > { %s260_s10 = scalar_lea.hbm %s1460_s2, %s667_s6  ;;  %s1206_s6 = sadd.s32 4294967295, %s1060_s28  }
  0x23   : > { %s261_s29 = sshll.u32 %s260_s10, 4  ;;  %s32_s5 = sadd.s32 1, %s1052_s26  ;;  %s1197_s29 = int_to_ptr.hbm [resolvable:$true] %s261_s29 }
  0x24   : > { %s35_s12 = sadd.s32 1, %s1056_s27  ;;  %p33_p9 = scmp.ge.s32.totalorder %s32_s5, 8 }
  0x25   : > { %s40_s9 = smul.u32 %s1052_s26, %s39_s8  ;;  %s41_s10 = ssub.s32 7, %s1052_s26 }
  0x26   : > { %s1503_s5 = smov (%p33_p9, %s32_s5), 0  ;;  %s1505_s12 = smov (!%p33_p9, %s35_s12), %s1056_s27 }
  0x27   : > { %1463 = sst [smem:[#allocation21_spill]] %s1503_s5  ;;  %s42_s30 = smul.u32 %s1056_s27, %s41_s10 }
  0x28   : > { %s46_s7 = ssub.s32 7, %s1503_s5  ;;  %p37_p10 = scmp.ge.s32.totalorder %s1505_s12, 2 }
  0x29   : > { %s52_s1 = sadd.s32 1, %s1040_s23  ;;  %s1220_s4 = sadd.s32 %s42_s30, %s40_s9 }
  0x2a   : > { %p59_p11 = scmp.ne.s32.totalorder %s1040_s23, %s1036_s22  ;;  %s1507_s12 = smov (%p37_p10, %s1505_s12), 0 }
  0x2b   : > { %1464 = sst [smem:[#allocation22_spill]] %s1507_s12  ;;  %p65_p13 = scmp.ne.s32.totalorder %s1036_s22, %s1032_s21 }
  0x2c   : > { %p1228_p12 = por %p60_p0, %p59_p11  ;;  %s44_s30 = ssub.s32 1, %s1507_s12 }
  0x2d   : > { %s47_s9 = smul.u32 %s46_s7, %s1507_s12  ;;  %p66_p1 = scmp.eq.s32.totalorder %s1206_s6, 0 }
  0x2e   : > { %s45_s10 = smul.u32 %s44_s30, %s1503_s5  ;;  %s75_s2 = ssub.s32 %s1056_s27, %s1507_s12 }
  0x2f   : > { %s78_s26 = sadd.s32 1, %s1028_s20  ;;  %p1241_p0 = por %p66_p1, %p65_p13 }
  0x30   : > { %s48_s24 = sadd.s32 %s47_s9, %s45_s10  ;;  %p76_p3 = scmp.eq.s32.totalorder %s75_s2, 0 }
  0x31   : > { %s49_s21 = ssub.s32 %s1220_s4, %s48_s24  ;;  %p1249_p7 = por %p91_p2, %p66_p1 }
  0x32   : > { %p50_p6 = scmp.eq.s32.totalorder %s49_s21, 0  ;;  %s165_s9 = sor.u32 %s75_s2, %s49_s21 }
  0x33   : > { %s1254_s30 = scalar_select %p76_p3, %s1028_s20, %s78_s26  }
  0x34   : > { %s1257_s12 = scalar_select %p50_p6, %s1040_s23, %s52_s1  }
  0x35   : > { %1468 = sst [smem:[#allocation23_spill]] %s1254_s30  ;;  %s168_s10 = sadd.s32 1, %s1016_s17 }
  0x36   : > { %1469 = sst [smem:[#allocation24_spill]] %s1257_s12  ;;  %p166_p9 = scmp.eq.s32.totalorder %s165_s9, 0 }
  0x37   : > { %p178_p10 = scmp.ne.s32.totalorder %s1016_s17, %s1012_s16  ;;  %p179_p11 = scmp.eq.s32.totalorder %s1206_s6, 15 }
  0x38   : > { %s1470_s24 = sld [smem:[#allocation20_spill]]  ;;  %p184_p13 = scmp.ne.s32.totalorder %s1012_s16, %s1008_s15 }
  0x39   : > { %s1266_s18 = scalar_select %p166_p9, %s1016_s17, %s168_s10  }
  0x3a   : > { %p1268_p2 = por %p179_p11, %p178_p10  ;;  %s1473_s26 = sadd.s32 4294967294, %s1060_s28  }
  0x3b   : > { %1471 = sst [smem:[#allocation25_spill]] %s1266_s18  ;;  %p185_p1 = scmp.eq.s32.totalorder %s1473_s26, 15 }
  0x3c   : > { %s205_s2 = sand.u32 1, %s1040_s23   ;;  %s646_s1 = sshll.u32 %s1220_s4, 3 }
  0x3d   : > { %p1276_p3 = por %p185_p1, %p184_p13  ;;  %s645_s9 = sshll.u32 %s205_s2, 3 }
  0x3e   : > { %s218_s30 = scalar_lea.hbm %s1431_s0, %s646_s1  ;;  %s209_s10 = scalar_lea.vmem [#allocation4], %s645_s9 }
  0x3f   : > { %s220_s20 = sshll.u32 %s218_s30, 4  ;;  %s222_s18 = sshll.u32 %s209_s10, 4  ;;  %s221_s20 = int_to_ptr.hbm [resolvable:$true] %s220_s20  ;;  %s223_s18 = int_to_ptr.vmem [resolvable:$true] %s222_s18 }
  0x40   : > { %p1287_p6 = pnand %p691_p4, %p1228_p12  ;;  %s1476_s4 = smov 8  }
  0x41   : > { %s1477_s23 = smov 128   ;;  %s1478_s17 = int_to_ptr.vmem [resolvable:$true] %s1470_s24 }
  0x42   : > { %686 = dma.hbm_to_vmem [thread:$0]  (!%p1179_p5), %s1197_s29, 512, %s1478_s17, %s1183_s14, %s1477_s23, %s1477_s23, %s1476_s4  }
  0x43   : > { %s206_s27 = scalar_lea.sflag [#allocation5], %s205_s2  ;;  %s880_s12 = sshra.s32 %s221_s20, 4  ;;  %s881_s12 = int_to_ptr.hbm [resolvable:$true] %s880_s12 }
  0x44   : > { %s882_s30 = scalar_lea.hbm %s881_s12, 8  ;;  %p884_p10 = pneg %p1287_p6 }
  0x45   : > { %p883_p9 = scmp.ne.s32.totalorder %s881_s12, %s882_s30  ;;  %s887_s9 = scalar_lea.hbm %s1431_s0, 64 }
  0x46   : > { %p889_p4 = scmp.lt.s32.totalorder %s887_s9, %s882_s30 }
  0x47   : > { %p885_p11 = pnand %p884_p10, %p883_p9 }
  0x49   : > { %p886_p13 = pneg %p885_p11 }
  0x4b   : > { %p891_p12 = pnand %p889_p4, %p886_p13 }
  0x4d   : > { %894 = shalt.err (!%p891_p12)
}
  0x4e   : > { %680 = dma.hbm_to_vmem [thread:$0]  (!%p1287_p6), %s221_s20, 128, %s223_s18, %s206_s27  }
  0x4f   : > { %281 = sbr.rel (%p1201_p8) target bundleno = 713 (0x2c9), region = 36  ;;  %s283_s17 = sand.u32 (!%p1201_p8), 1, %s1036_s22  }
  0x50   : > { %s1310_s23 = sshll.u32 (!%p1201_p8), %s283_s17, 3  ;;  %s284_s13 = scalar_lea.sflag (!%p1201_p8), [#allocation5], %s283_s17 }
  0x51   : > { %s287_s14 = scalar_lea.vmem (!%p1201_p8), [#allocation4], %s1310_s23 }
  0x54   : > { %995 = dma.done.wait (%p1241_p0), %s284_s13, 128  }
  0x55   : > { %997 = vsyncadd (%p1241_p0), %s284_s13, 4294967168  ;;  %s293_s20 = sand.u32 1, %s1206_s6   ;;  %s295_s29 = sand.u32 1, %s1024_s19  }
  0x56   : > { %s655_s11 = sshll.u32 %s295_s29, 5  ;;  %s294_s24 = scalar_lea.sflag [#allocation8], %s293_s20 }
  0x57   : > { %s297_s18 = scalar_lea.vmem [#allocation7], %s655_s11 }
  0x58   : > { %999 = dma.done.wait (%p1249_p7), %s294_s24, 1024  }
  0x59   : > { %1001 = vsyncadd (%p1249_p7), %s294_s24, 4294966272  ;;  %s343_s2 = sand.u32 1, %s1012_s16   ;;  %p351_p5 = scmp.lt.s32.totalorder %s1048_s25, 1 }
  0x5a   : > { %s1326_s3 = sshll.u32 %s343_s2, 3  ;;  %s1479_s4 = sld [smem:[#allocation28_spill]] }
  0x5b   : > { %s1330_s6 = scalar_select %p351_p5, %s1048_s25, 1 }
  0x5c   : > { %s307_s12 = scalar_lea.vmem [#allocation9], %s655_s11  ;;  %s345_s7 = scalar_lea.vmem [#allocation10], %s1326_s3 }
  0x5d   : > { %s1480_s30 = sld [smem:[#allocation17_spill]] }
  0x60   : > { %s353_s27 = scalar_lea.vmem %s1479_s4, %s1330_s6 }
  0x63   : > { %p658_p8 = scmp.ne.s32.totalorder %s1480_s30, 0 }
  0x65   : > { %362 = sbr.rel (%p658_p8) target bundleno = 109 (0x6d), region = 52 }
  0x6a   : > { %vm363_vm0 = vcmask 261120   ;;  %v1064_v0 = vmov 0.0  }
  0x6b   : > { %364 = vst.msk [vmem:[#allocation2] sm:$0xff] %vm363_vm0, %v1064_v0 }
  0x6c   : > { %365 = vst.msk [vmem:[#allocation3] sm:$0xff] %vm363_vm0, %v1064_v0 }
  0x6d PF: > { %v376_v1 = vld [vmem:[%s307_s12 + $0x18] sm:$0xff]  ;;  %v375_v3 = vld [vmem:[%s307_s12 + $0x10] sm:$0xff]  ;;  %v374_v5 = vld [vmem:[%s307_s12 + $0x8] sm:$0xff]  ;;  %vm377_vm1 = vcmask 261120   ;;  %s1065_s17 = smov 64   ;;  %s1066_s23 = smov 32  }
  0x6e   : > { %v372_v2 = vld [vmem:[%s297_s18 + $0x18] sm:$0xff]  ;;  %393 = vmatpush.msra.mxu0 %v376_v1  ;;  %v371_v4 = vld [vmem:[%s297_s18 + $0x10] sm:$0xff]  ;;  %v370_v6 = vld [vmem:[%s297_s18 + $0x8] sm:$0xff]  ;;  %s1482_s13 = sld [smem:[#allocation17_spill]]  ;;  %s489_s20 = ssub.s32 1, %s1048_s25 }
  0x6f   : > { %416 = vmatpush.msra.mxu1 %v372_v2  ;;  %v373_v7 = vld [vmem:[%s307_s12] sm:$0xff]  ;;  %v366_v10 = vld [vmem:[%s287_s14] sm:$0xff]  ;;  %s1067_s14 = smov 96   ;;  %s663_s6 = sshll.u32 %s1048_s25, 3 }
  0x70   : > { %394 = vmatpush.msra.mxu0 %v375_v3  ;;  %v369_v8 = vld [vmem:[%s297_s18] sm:$0xff]  ;;  %s1483_s12 = sld [smem:[#allocation29_spill]]  ;;  %s501_s8 = sshll.u32 %s345_s7, 4  ;;  %s502_s8 = int_to_ptr.vmem [resolvable:$true] %s501_s8 }
  0x71   : > { %417 = vmatpush.msra.mxu1 %v371_v4  ;;  %v811_v11 = vld [vmem:[%s353_s27] ss:$0 sm:$0xff] }
  0x72   : > { %395 = vmatpush.msra.mxu0 %v374_v5  ;;  %v367_v9 = vld [vmem:[#allocation2] sm:$0xff] }
  0x73   : > { %418 = vmatpush.msra.mxu1 %v370_v6  ;;  %v368_v17 = vld [vmem:[#allocation3] sm:$0xff] }
  0x74   : > { %396 = vmatpush.msra.mxu0 %v373_v7  ;;  %s491_s29 = ssub.s32 7, %s1482_s13  ;;  %s490_s11 = smul.u32 %s1482_s13, %s489_s20 }
  0x75   : > { %419 = vmatpush.msra.mxu1 %v369_v8  ;;  %659 = vmatmul.msk.f32.vlgmr.msra.gmra.mxu0 %vm377_vm1, %v367_v9  ;;  %s492_s24 = smul.u32 %s1048_s25, %s491_s29  ;;  %s482_s25 = scalar_lea.sflag [#allocation6], %s343_s2 }
  0x76   : > { %660 = vmatmul.msk.f32.vlgmr.msra.gmra.mxu1 %vm377_vm1, %v366_v10 }
  0x77   : > { %s493_s18 = sadd.s32 %s492_s24, %s490_s11 }
  0x78   : > { %s497_s10 = sadd.s32 %s663_s6, %s493_s18 }
  0x79   : > { %s664_s26 = sshll.u32 %s497_s10, 3 }
  0x7a   : > { %s499_s30 = scalar_lea.hbm %s1483_s12, %s664_s26 }
  0x7b   : > { %s503_s1 = sshll.u32 %s499_s30, 4  ;;  %s504_s1 = int_to_ptr.hbm [resolvable:$true] %s503_s1 }
  0x7c   : > { %s924_s9 = sshra.s32 %s504_s1, 4  ;;  %s925_s9 = int_to_ptr.hbm [resolvable:$true] %s924_s9 }
  0x7d   : > { %p931_p6 = scmp.lt.s32.totalorder %s925_s9, %s1483_s12 }
  0xf2   : > { %v398_v12 = vpop.f32.mrf.mxu0 }
  0xf3   : > { %v421_v13 = vpop.f32.mrf.mxu1 }
  0xf4   : > { %v422_v14 = vadd.f32 %v421_v13, %v398_v12 }
  0xf6   : > { %v428_v15 = vadd.f32 %v811_v11, %v422_v14 }
  0xf8   : > { %812 = vtanh.f32 %v428_v15  ;;  %v661_v18 = vmul.f32 -1.442695, %v428_v15 }
  0xfa   : > { %814 = vpow2.f32 %v661_v18 }
  0xfe   : > { %v813_v16 = vpop.eup %812 }
  0xff   : > { %455 = vrot.lane.b32.xlu0 %v813_v16, %s1065_s17 }
 0x100   : > { %v815_v19 = vpop.eup %814 }
 0x101   : > { %v432_v20 = vadd.f32 1.0, %v815_v19 }
 0x103   : > { %816 = vrcp.f32 %v432_v20  ;;  %v444_v26 = vand.u32 2147483648, %v432_v20  ;;  %vm438_vm3 = vweird.f32 %v432_v20  ;;  %v442_v27 = vand.u32 2147483647, %v432_v20 }
 0x105   : > { %v445_v29 = vor.u32 1.1754944e-38, %v444_v26  ;;  %vm443_vm5 = vcmp.eq.f32.partialorder %v442_v27, 8.507059e+37 }
 0x107   : > { %450 = vrot.lane.b32.xlu0 %v368_v17, %s1066_s23 }
 0x109   : > { %v817_v21 = vpop.eup %816 }
 0x10a   : > { %v434_v22 = vmul.f32 %v817_v21, %v432_v20  ;;  %vm439_vm2 = vweird.f32 %v817_v21 }
 0x10b   : > { %vm440_vm4 = vmor %vm438_vm3, %vm439_vm2 }
 0x10c   : > { %v435_v23 = vsub.f32 1.0, %v434_v22 }
 0x10e   : > { %v436_v24 = vmul.f32 %v817_v21, %v435_v23 }
 0x110   : > { %v437_v25 = vadd.f32 %v817_v21, %v436_v24 }
 0x112   : > { %v441_v28 = vsel %vm440_vm4, %v817_v21, %v437_v25 }
 0x113   : > { %v446_v31 = vsel %vm443_vm5, %v445_v29, %v441_v28 }
 0x171   : > { %v456_v30 = vpop.permute.xlu0 %455 }
 0x172   : > { %v458_v32 = vmul.f32 %v456_v30, %v446_v31 }
 0x174   : > { %460 = vrot.lane.b32.xlu1 %v458_v32, %s1066_s23 }
 0x179   : > { %v451_v33 = vpop.permute.xlu0 %450 }
 0x17a   : > { %v453_v34 = vmul.f32 %v451_v33, %v446_v31 }
 0x1e6   : > { %v461_v35 = vpop.permute.xlu1 %460 }
 0x1e7   : > { %v463_v36 = vadd.f32 %v461_v35, %v453_v34 }
 0x1e9   : > { %818 = vtanh.f32 %v463_v36 }
 0x1ef   : > { %v819_v37 = vpop.eup %818 }
 0x1f0   : > { %466 = vrot.lane.b32.xlu1 %v819_v37, %s1065_s17  ;;  %s926_s17 = scalar_lea.hbm %s925_s9, 8 }
 0x1f1   : > { %p927_p0 = scmp.ne.s32.totalorder %s925_s9, %s926_s17 }
 0x1f3   : > { %p928_p7 = pnand %p927_p0, %p1268_p2 }
 0x1f5   : > { %p929_p1 = pneg %p928_p7 }
 0x262   : > { %v467_v38 = vpop.permute.xlu1 %466 }
 0x263   : > { %v469_v39 = vmul.f32 %v467_v38, %v446_v31 }
 0x265   : > { %476 = vrot.lane.b32.xlu2 %v469_v39, %s1066_s23 }
 0x26d   : > { %471 = vrot.lane.b32.xlu2 %v463_v36, %s1067_s14  ;;  %s930_s14 = scalar_lea.hbm %s1483_s12, 128 }
 0x26e   : > { %p932_p9 = scmp.lt.s32.totalorder %s930_s14, %s926_s17 }
 0x270   : > { %p933_p10 = por %p932_p9, %p931_p6 }
 0x272   : > { %p934_p11 = pnand %p933_p10, %p929_p1 }
 0x2bf   : > { %v477_v40 = vpop.permute.xlu2 %476 }
 0x2c0   : > { %479 = vst.msk [vmem:[#allocation2] sm:$0xff] %vm377_vm1, %v477_v40 }
 0x2c1   : > { %480 = vst.msk [vmem:[%s345_s7] sm:$0xff] %vm377_vm1, %v477_v40 }
 0x2c2   : > { %937 = shalt.err (!%p934_p11)
}
 0x2c3   : > { %675 = dma.vmem_to_hbm [thread:$0]  (%p1268_p2), %s502_s8, 128, %s504_s1, %s482_s25  }
 0x2c7   : > { %v472_v41 = vpop.permute.xlu2 %471 }
 0x2c8   : > { %474 = vst.msk [vmem:[#allocation3] sm:$0xff] %vm377_vm1, %v472_v41 }
 0x2c9 PF: > { %p692_p13 = scmp.ge.s32.totalorder %s1060_s28, 2  ;;  %s515_s2 = sand.u32 1, %s1008_s15  }
 0x2ca   : > { %s516_s3 = scalar_lea.sflag [#allocation6], %s515_s2 }
 0x2cb   : > { %p688_p4 = pnand %p692_p13, %p1276_p3 }
 0x2cd   : > { %p689_p12 = pneg %p688_p4 }
 0x2cf   : > { %1003 = dma.done.wait (%p689_p12), %s516_s3, 128  }
 0x2d0   : > { %1005 = vsyncadd (%p689_p12), %s516_s3, 4294967168  ;;  %s23_s28 = sadd.s32 1, %s1060_s28   ;;  %s1485_s7 = sld [smem:[#allocation14_spill]] }
 0x2d1   : > { %p1384_p5 = scmp.ge.s32.totalorder %s23_s28, 18   ;;  %s1486_s17 = sld [smem:[#allocation25_spill]] }
 0x2d2   : > { %s1487_s11 = sld [smem:[#allocation15_spill]]  ;;  %s1495_s15 = smov %s1012_s16 }
 0x2d3   : > { %s1488_s20 = sld [smem:[#allocation23_spill]]  ;;  %s1497_s18 = smov %s1024_s19 }
 0x2d4   : > { %s1489_s24 = sld [smem:[#allocation16_spill]]  ;;  %s1499_s21 = smov %s1036_s22 }
 0x2d5   : > { %s1490_s23 = sld [smem:[#allocation24_spill]] }
 0x2d6   : > { %s1491_s6 = sld [smem:[#allocation18_spill]]  ;;  %s1496_s16 = smov %s1485_s7 }
 0x2d7   : > { %s1492_s25 = sld [smem:[#allocation19_spill]] }
 0x2d8   : > { %s1493_s26 = sld [smem:[#allocation21_spill]]  ;;  %s1498_s19 = smov %s1487_s11 }
 0x2d9   : > { %s1494_s27 = sld [smem:[#allocation22_spill]]  ;;  %22 = sbr.rel (!%p1384_p5) target bundleno = 17 (0x11), region = 112 }
 0x2da   : > { %s1500_s22 = smov %s1489_s24 }
 0x2dc   : > { %s1501_s24 = smov %s1491_s6 }
 0x2de   :  { %522 = vsyncpa [#allocation5], 1 }
 0x2df   :  { %524 = vsyncpa [#allocation5 + $0x1], 1 }
 0x2e0   :  { %525 = vsyncpa [#allocation8], 1 }
 0x2e1   :  { %527 = vsyncpa [#allocation8 + $0x1], 1 }
 0x2e2   :  { %528 = vsyncpa [#allocation6], 1 }
 0x2e3   :  { %530 = vsyncpa [#allocation6 + $0x1], 1 }

</bundles_post_ra>
